<compile_context>
chip_gen: v7x
topology: tpu7x:2x2x1
jax: 0.10.0
libtpu: 0.0.40
codegen_flags: <defaults>
</compile_context>

<pallas_src>
import functools

import jax
import jax.numpy as jnp
from jax import lax
from jax.experimental import pallas as pl
from jax.experimental.pallas import tpu as pltpu


_CONTRACT_AX0 = (((0,), (0,)), ((), ()))   # contract axis 0 of both operands
_ROW_BY_MAT = (((1,), (0,)), ((), ()))     # (1,K) @ (K,N)


# --------------------------------------------------------------------------
# Kernel
# --------------------------------------------------------------------------
def _vic_loss_kernel(x_ref, y_ref, out_ref,
                     sx_ref, sy_ref, sd2_ref, gx_ref, gy_ref, *,
                     sim_coeff, std_coeff, cov_coeff, batch_size, n_total,
                     epilogue_block):
    i = pl.program_id(0)

    @pl.when(i == 0)
    def _init():
        sx_ref[...] = jnp.zeros_like(sx_ref)
        sy_ref[...] = jnp.zeros_like(sy_ref)
        sd2_ref[...] = jnp.zeros_like(sd2_ref)
        gx_ref[...] = jnp.zeros_like(gx_ref)
        gy_ref[...] = jnp.zeros_like(gy_ref)

    # ---------------- hot loop ----------------
    x_raw = x_ref[...]
    y_raw = y_ref[...]
    tn, d = x_raw.shape
    x = x_raw.astype(jnp.float32)
    y = y_raw.astype(jnp.float32)
    diff = x - y

    if tn % 8 == 0:
        # Reduce only across sublane *groups*; accumulators stay (8, D) so the
        # per-step work is pure VPU adds.  The single cross-sublane reduce
        # happens once, in the epilogue.
        def _accumulate(ref, v):
            ref[...] += jnp.sum(v.reshape(tn // 8, 8, d), axis=0)
    else:
        # Ragged-tile fallback: full cross-sublane reduce into row 0.
        def _accumulate(ref, v):
            ref[0:1, :] += jnp.sum(v, axis=0, keepdims=True)

    _accumulate(sx_ref, x)
    _accumulate(sy_ref, y)
    _accumulate(sd2_ref, diff * diff)

    # Unscaled grams, contracting directly on the batch axis (no transpose);
    # MXU consumes the inputs' native dtype, accumulation is f32.
    gx_ref[...] += lax.dot_general(x_raw, x_raw, _CONTRACT_AX0,
                                   preferred_element_type=jnp.float32)
    gy_ref[...] += lax.dot_general(y_raw, y_raw, _CONTRACT_AX0,
                                   preferred_element_type=jnp.float32)

    # ---------------- epilogue (last grid step only) ----------------
    @pl.when(i == pl.num_programs(0) - 1)
    def _finalize():
        n = float(n_total)
        inv_n = 1.0 / n
        eb = epilogue_block

        def view_stats(g_ref, s_ref):
            """Per-view (css (1,D), Σ off-diag(G_c)²) from the raw gram and
            the per-feature sum accumulator; the gram is scanned in row
            blocks so no (D,D) f32 temporary is materialized."""
            mean = jnp.sum(s_ref[...], axis=0, keepdims=True) * inv_n   # (1,D)

            if eb == d:                     # single-block path (small / odd D)
                g = g_ref[...]
                ssq = jnp.sum(g * g)
                row = lax.broadcasted_iota(jnp.int32, (d, d), 0)
                col = lax.broadcasted_iota(jnp.int32, (d, d), 1)
                diag = jnp.sum(jnp.where(row == col, g, 0.0),
                               axis=0, keepdims=True)                    # (1,D)
                gm = lax.dot_general(mean, g, _ROW_BY_MAT,
                                     preferred_element_type=jnp.float32)
            else:                           # blocked path for large D
                # Stash the mean so row blocks of it can be read via ref
                # slices inside the loop.
                s_ref[0:1, :] = mean

                def body(b, carry):
                    ssq, diag, gm = carry
                    r0 = pl.multiple_of(b * eb, eb)
                    blk = g_ref[pl.ds(r0, eb), :]                        # (eb,D)
                    ssq = ssq + jnp.sum(blk * blk)
                    row = lax.broadcasted_iota(jnp.int32, (eb, d), 0)
                    col = lax.broadcasted_iota(jnp.int32, (eb, d), 1)
                    diag = diag + jnp.sum(
                        jnp.where(col == row + r0, blk, 0.0),
                        axis=0, keepdims=True)
                    mrow = s_ref[0:1, pl.ds(r0, eb)]                     # (1,eb)
                    gm = gm + lax.dot_general(
                        mrow, blk, _ROW_BY_MAT,
                        preferred_element_type=jnp.float32)
                    return ssq, diag, gm

                ssq, diag, gm = lax.fori_loop(
                    0, d // eb, body,
                    (jnp.float32(0.0),
                     jnp.zeros((1, d), jnp.float32),
                     jnp.zeros((1, d), jnp.float32)))

            css = diag - n * mean * mean         # Σ (x − μ)² per feature
            mgm = jnp.sum(gm * mean)             # μ G μᵀ
            sum_mu2 = jnp.sum(mean * mean)
            off = (ssq - 2.0 * n * mgm + (n * sum_mu2) ** 2
                   - jnp.sum(css * css))
            return css, off

        css_x, off_x = view_stats(gx_ref, sx_ref)
        css_y, off_y = view_stats(gy_ref, sy_ref)

        # Invariance: MSE over all N·D elements.
        repr_loss = jnp.sum(sd2_ref[...]) * (1.0 / (n * d))

        # Variance hinge (unbiased variance over the gathered batch).
        inv_nm1 = 1.0 / (n - 1.0)
        std_x = jnp.sqrt(css_x * inv_nm1 + 1e-4)
        std_y = jnp.sqrt(css_y * inv_nm1 + 1e-4)
        std_loss = (0.5 / d) * (jnp.sum(jnp.maximum(1.0 - std_x, 0.0))
                                + jnp.sum(jnp.maximum(1.0 - std_y, 0.0)))

        # Covariance: off-diagonal squared sums, all scales folded here.
        cov_scale = 1.0 / (float(batch_size - 1) ** 2 * d)
        cov_loss = (off_x + off_y) * cov_scale

        out_ref[0, 0] = (sim_coeff * repr_loss
                         + std_coeff * std_loss
                         + cov_coeff * cov_loss)


# --------------------------------------------------------------------------
# Sizing helpers (generation-aware via get_tpu_info)
# --------------------------------------------------------------------------
def _round_up(v, m):
    return (v + m - 1) // m * m


def _tpu_vmem_capacity_bytes():
    try:
        cap = getattr(pltpu.get_tpu_info(), "vmem_capacity_bytes", None)
        if cap:
            return int(cap)
    except Exception:
        pass
    return 64 << 20   # conservative fallback (v7x-sized)


def _epilogue_block(d):
    """Row-block size used to scan the (D, D) grams in the epilogue."""
    for eb in (256, 128):
        if d > eb and d % eb == 0:
            return eb
    return d


def _resident_bytes(d):
    d_lane = _round_up(d, 128)
    grams = 2 * d * d_lane * 4
    feat = 3 * 8 * d_lane * 4
    epilogue = 4 * _epilogue_block(d) * d_lane * 4
    return grams + feat + epilogue


def _choose_tile_n(n, d, itemsize, vmem_cap):
    """Largest batch tile that divides N, fits the streamed-tile budget, and
    is MXU-deep / sublane-pack aligned (the gram contraction depth is tn)."""
    pack = max(8, 32 // itemsize)               # 8 f32 / 16 bf16 / 32 int8
    d_lane = _round_up(d, 128)
    ceiling = int(vmem_cap * 0.85)              # leave compiler headroom
    budget = ceiling - _resident_bytes(d) - (4 << 20)
    if budget <= 0:
        # TODO(synk): feature-block tiling of the grams for very large D.
        budget = 4 << 20
    cap = max(pack, budget // (2 * 2 * d_lane * itemsize))  # 2 inputs x 2 bufs
    if n <= cap:
        return n
    # Prefer MXU-deep (256/128-row) tiles; never fall below the dtype pack.
    for align in (256, 128, pack):
        if align > cap or n % align != 0:
            continue
        t = (cap // align) * align
        while t >= align:
            if n % t == 0:
                return t
            t -= align
    # TODO(synk): pad ragged N instead of falling back to a monolithic block.
    return n


def _vmem_limit_bytes(tn, d, itemsize, vmem_cap, n_buf):
    d_lane = _round_up(d, 128)
    streamed = 2 * n_buf * tn * d_lane * itemsize
    total = streamed + _resident_bytes(d) + (4 << 20)
    ceiling = int(vmem_cap * 0.85)   # ~108 MiB on 128 MiB parts, ~54 MiB on v7x
    return int(min(max(total, 32 << 20), ceiling))


# --------------------------------------------------------------------------
# Wrapper
# --------------------------------------------------------------------------
def vic_loss(x, y, *, sim_coeff=25.0, std_coeff=25.0, cov_coeff=1.0,
             batch_size=None, tile_n=None):
    """VICReg loss. x, y: (N, D) embeddings. Returns a scalar float32."""
    assert x.shape == y.shape and x.ndim == 2
    n, d = x.shape
    if batch_size is None:
        batch_size = n  # single-device "all-gather" => effective batch = N
    itemsize = jnp.dtype(x.dtype).itemsize
    vmem_cap = _tpu_vmem_capacity_bytes()
    tn = tile_n if tile_n is not None else _choose_tile_n(n, d, itemsize, vmem_cap)
    assert n % tn == 0, (n, tn)
    steps = n // tn

    # Deeper input buffering hides DMA latency on small-D, many-step
    # (HBM-bound, esp. v5e) configurations.
    n_buf = 3 if (d * itemsize <= 2048 and steps >= 4) else 2

    def _in_spec():
        if n_buf == 2:
            return pl.BlockSpec((tn, d), lambda i: (i, 0))
        return pl.BlockSpec((tn, d), lambda i: (i, 0),
                            pipeline_mode=pl.Buffered(n_buf))

    kernel = functools.partial(
        _vic_loss_kernel,
        sim_coeff=float(sim_coeff),
        std_coeff=float(std_coeff),
        cov_coeff=float(cov_coeff),
        batch_size=int(batch_size),
        n_total=int(n),
        epilogue_block=_epilogue_block(d),
    )

    out = pl.pallas_call(
        kernel,
        out_shape=jax.ShapeDtypeStruct((1, 1), jnp.float32),
        grid_spec=pltpu.PrefetchScalarGridSpec(
            num_scalar_prefetch=0,
            grid=(steps,),
            in_specs=[_in_spec(), _in_spec()],
            out_specs=pl.BlockSpec(memory_space=pltpu.SMEM),
            scratch_shapes=[
                pltpu.VMEM((8, d), jnp.float32),   # Σx  (per-sublane partials)
                pltpu.VMEM((8, d), jnp.float32),   # Σy
                pltpu.VMEM((8, d), jnp.float32),   # Σ(x−y)²
                pltpu.VMEM((d, d), jnp.float32),   # XᵀX accumulator
                pltpu.VMEM((d, d), jnp.float32),   # YᵀY accumulator
            ],
        ),
        compiler_params=pltpu.CompilerParams(
            dimension_semantics=("arbitrary",),
            vmem_limit_bytes=_vmem_limit_bytes(tn, d, itemsize, vmem_cap, n_buf),
        ),
    )(x, y)
    return out[0, 0]


# --------------------------------------------------------------------------
# Plain-JAX reference mirroring the PyTorch forward (single worker)
# --------------------------------------------------------------------------
def _vic_loss_ref(x, y, *, sim_coeff=25.0, std_coeff=25.0, cov_coeff=1.0,
                  batch_size=None):
    n, d = x.shape
    if batch_size is None:
        batch_size = n
    x = x.astype(jnp.float32)
    y = y.astype(jnp.float32)
    repr_loss = jnp.mean((x - y) ** 2)
    xc = x - x.mean(0)
    yc = y - y.mean(0)
    std_x = jnp.sqrt(jnp.var(xc, axis=0, ddof=1) + 1e-4)
    std_y = jnp.sqrt(jnp.var(yc, axis=0, ddof=1) + 1e-4)
    std_loss = 0.5 * (jnp.mean(jax.nn.relu(1 - std_x))
                      + jnp.mean(jax.nn.relu(1 - std_y)))
    cov_x = xc.T @ xc / (batch_size - 1)
    cov_y = yc.T @ yc / (batch_size - 1)
    mask = 1.0 - jnp.eye(d, dtype=jnp.float32)
    cov_loss = (jnp.sum((cov_x * mask) ** 2) / d
                + jnp.sum((cov_y * mask) ** 2) / d)
    return sim_coeff * repr_loss + std_coeff * std_loss + cov_coeff * cov_loss


if __name__ == "__main__":
    key = jax.random.PRNGKey(0)
    kx, ky = jax.random.split(key)
    N, D = 16, 32  # small N x D embeddings (expander outputs)
    x = jax.random.normal(kx, (N, D), dtype=jnp.float32)
    y = x + 0.1 * jax.random.normal(ky, (N, D), dtype=jnp.float32)

    ref = jax.block_until_ready(_vic_loss_ref(x, y))

    # Single-block path (grid = 1) and multi-step reduction path (grid = 2).
    loss_full = jax.block_until_ready(vic_loss(x, y))
    loss_tiled = jax.block_until_ready(vic_loss(x, y, tile_n=8))

    for name, loss in (("full", loss_full), ("tiled", loss_tiled)):
        assert jnp.isfinite(loss), f"{name}: kernel produced non-finite loss"
        assert jnp.allclose(loss, ref, rtol=2e-4, atol=2e-4), \
            (name, float(loss), float(ref))
    print("KERNEL_OK")
</pallas_src>

<mosaic_0001>
module attributes {stable_mosaic.version = 11 : i64} {
  func.func @_vic_loss_kernel(%arg0: i32, %arg1: memref<16x32xf32, #tpu.memory_space<vmem>>, %arg2: memref<16x32xf32, #tpu.memory_space<vmem>>, %arg3: memref<1x1xf32, #tpu.memory_space<smem>>, %arg4: memref<8x32xf32, #tpu.memory_space<vmem>>, %arg5: memref<8x32xf32, #tpu.memory_space<vmem>>, %arg6: memref<8x32xf32, #tpu.memory_space<vmem>>, %arg7: memref<32x32xf32, #tpu.memory_space<vmem>>, %arg8: memref<32x32xf32, #tpu.memory_space<vmem>>) attributes {dimension_semantics = [#tpu.dimension_semantics<arbitrary>], iteration_bounds = array<i64: 1>, scalar_prefetch = 0 : i64, scratch_operands = 5 : i64, tpu.core_type = #tpu.core_type<tc>, window_params = [{transform_indices = @transform_0, window_bounds = array<i64: 16, 32>}, {transform_indices = @transform_1, window_bounds = array<i64: 16, 32>}, {transform_indices = @transform_2, window_bounds = array<i64: 1, 1>}]} {
    %c0_i32 = arith.constant 0 : i32
    %0 = arith.cmpi eq, %arg0, %c0_i32 : i32
    %1 = arith.extui %0 : i1 to i32
    %c0_i32_0 = arith.constant 0 : i32
    %2 = arith.cmpi ne, %1, %c0_i32_0 : i32
    scf.if %2 {
      %cst_30 = arith.constant 0.000000e+00 : f32
      %33 = vector.broadcast %cst_30 : f32 to vector<8x32xf32>
      %c0_31 = arith.constant 0 : index
      %c0_32 = arith.constant 0 : index
      %34 = vector.load %arg4[%c0_31, %c0_32] : memref<8x32xf32, #tpu.memory_space<vmem>>, vector<8x32xf32>
      tpu.vector_store %arg4[%c0_31, %c0_32], %33 {strides = array<i32>} : memref<8x32xf32, #tpu.memory_space<vmem>>, vector<8x32xf32>,
      %cst_33 = arith.constant 0.000000e+00 : f32
      %35 = vector.broadcast %cst_33 : f32 to vector<8x32xf32>
      %c0_34 = arith.constant 0 : index
      %c0_35 = arith.constant 0 : index
      %36 = vector.load %arg5[%c0_34, %c0_35] : memref<8x32xf32, #tpu.memory_space<vmem>>, vector<8x32xf32>
      tpu.vector_store %arg5[%c0_34, %c0_35], %35 {strides = array<i32>} : memref<8x32xf32, #tpu.memory_space<vmem>>, vector<8x32xf32>,
      %cst_36 = arith.constant 0.000000e+00 : f32
      %37 = vector.broadcast %cst_36 : f32 to vector<8x32xf32>
      %c0_37 = arith.constant 0 : index
      %c0_38 = arith.constant 0 : index
      %38 = vector.load %arg6[%c0_37, %c0_38] : memref<8x32xf32, #tpu.memory_space<vmem>>, vector<8x32xf32>
      tpu.vector_store %arg6[%c0_37, %c0_38], %37 {strides = array<i32>} : memref<8x32xf32, #tpu.memory_space<vmem>>, vector<8x32xf32>,
      %cst_39 = arith.constant 0.000000e+00 : f32
      %39 = vector.broadcast %cst_39 : f32 to vector<32x32xf32>
      %c0_40 = arith.constant 0 : index
      %c0_41 = arith.constant 0 : index
      %40 = vector.load %arg7[%c0_40, %c0_41] : memref<32x32xf32, #tpu.memory_space<vmem>>, vector<32x32xf32>
      tpu.vector_store %arg7[%c0_40, %c0_41], %39 {strides = array<i32>} : memref<32x32xf32, #tpu.memory_space<vmem>>, vector<32x32xf32>,
      %cst_42 = arith.constant 0.000000e+00 : f32
      %41 = vector.broadcast %cst_42 : f32 to vector<32x32xf32>
      %c0_43 = arith.constant 0 : index
      %c0_44 = arith.constant 0 : index
      %42 = vector.load %arg8[%c0_43, %c0_44] : memref<32x32xf32, #tpu.memory_space<vmem>>, vector<32x32xf32>
      tpu.vector_store %arg8[%c0_43, %c0_44], %41 {strides = array<i32>} : memref<32x32xf32, #tpu.memory_space<vmem>>, vector<32x32xf32>,
    } else {
    }
    %c0 = arith.constant 0 : index
    %c0_1 = arith.constant 0 : index
    %3 = vector.load %arg1[%c0, %c0_1] : memref<16x32xf32, #tpu.memory_space<vmem>>, vector<16x32xf32>
    %c0_2 = arith.constant 0 : index
    %c0_3 = arith.constant 0 : index
    %4 = vector.load %arg2[%c0_2, %c0_3] : memref<16x32xf32, #tpu.memory_space<vmem>>, vector<16x32xf32>
    %5 = arith.subf %3, %4 : vector<16x32xf32>
    %c0_4 = arith.constant 0 : index
    %c0_5 = arith.constant 0 : index
    %6 = vector.load %arg4[%c0_4, %c0_5] : memref<8x32xf32, #tpu.memory_space<vmem>>, vector<8x32xf32>
    %7 = vector.shape_cast %3 : vector<16x32xf32> to vector<2x8x32xf32>
    %cst = arith.constant dense<0.000000e+00> : vector<8x32xf32>
    %8 = vector.multi_reduction <add>, %7, %cst [0] : vector<2x8x32xf32> to vector<8x32xf32>
    %9 = arith.addf %6, %8 : vector<8x32xf32>
    %c0_6 = arith.constant 0 : index
    %c0_7 = arith.constant 0 : index
    %10 = vector.load %arg4[%c0_6, %c0_7] : memref<8x32xf32, #tpu.memory_space<vmem>>, vector<8x32xf32>
    tpu.vector_store %arg4[%c0_6, %c0_7], %9 {strides = array<i32>} : memref<8x32xf32, #tpu.memory_space<vmem>>, vector<8x32xf32>,
    %c0_8 = arith.constant 0 : index
    %c0_9 = arith.constant 0 : index
    %11 = vector.load %arg5[%c0_8, %c0_9] : memref<8x32xf32, #tpu.memory_space<vmem>>, vector<8x32xf32>
    %12 = vector.shape_cast %4 : vector<16x32xf32> to vector<2x8x32xf32>
    %cst_10 = arith.constant dense<0.000000e+00> : vector<8x32xf32>
    %13 = vector.multi_reduction <add>, %12, %cst_10 [0] : vector<2x8x32xf32> to vector<8x32xf32>
    %14 = arith.addf %11, %13 : vector<8x32xf32>
    %c0_11 = arith.constant 0 : index
    %c0_12 = arith.constant 0 : index
    %15 = vector.load %arg5[%c0_11, %c0_12] : memref<8x32xf32, #tpu.memory_space<vmem>>, vector<8x32xf32>
    tpu.vector_store %arg5[%c0_11, %c0_12], %14 {strides = array<i32>} : memref<8x32xf32, #tpu.memory_space<vmem>>, vector<8x32xf32>,
    %16 = arith.mulf %5, %5 : vector<16x32xf32>
    %c0_13 = arith.constant 0 : index
    %c0_14 = arith.constant 0 : index
    %17 = vector.load %arg6[%c0_13, %c0_14] : memref<8x32xf32, #tpu.memory_space<vmem>>, vector<8x32xf32>
    %18 = vector.shape_cast %16 : vector<16x32xf32> to vector<2x8x32xf32>
    %cst_15 = arith.constant dense<0.000000e+00> : vector<8x32xf32>
    %19 = vector.multi_reduction <add>, %18, %cst_15 [0] : vector<2x8x32xf32> to vector<8x32xf32>
    %20 = arith.addf %17, %19 : vector<8x32xf32>
    %c0_16 = arith.constant 0 : index
    %c0_17 = arith.constant 0 : index
    %21 = vector.load %arg6[%c0_16, %c0_17] : memref<8x32xf32, #tpu.memory_space<vmem>>, vector<8x32xf32>
    tpu.vector_store %arg6[%c0_16, %c0_17], %20 {strides = array<i32>} : memref<8x32xf32, #tpu.memory_space<vmem>>, vector<8x32xf32>,
    %c0_18 = arith.constant 0 : index
    %c0_19 = arith.constant 0 : index
    %22 = vector.load %arg7[%c0_18, %c0_19] : memref<32x32xf32, #tpu.memory_space<vmem>>, vector<32x32xf32>
    %cst_20 = arith.constant dense<0.000000e+00> : vector<32x32xf32>
    %23 = tpu.matmul %3, %3, %cst_20 {dimension_numbers = #tpu.dot_dimension_numbers<[0], [0], [1], [1], [0, 1, 1, 1], [], []>} : vector<16x32xf32>, vector<16x32xf32>, vector<32x32xf32> -> vector<32x32xf32>
    %24 = arith.addf %22, %23 : vector<32x32xf32>
    %c0_21 = arith.constant 0 : index
    %c0_22 = arith.constant 0 : index
    %25 = vector.load %arg7[%c0_21, %c0_22] : memref<32x32xf32, #tpu.memory_space<vmem>>, vector<32x32xf32>
    tpu.vector_store %arg7[%c0_21, %c0_22], %24 {strides = array<i32>} : memref<32x32xf32, #tpu.memory_space<vmem>>, vector<32x32xf32>,
    %c0_23 = arith.constant 0 : index
    %c0_24 = arith.constant 0 : index
    %26 = vector.load %arg8[%c0_23, %c0_24] : memref<32x32xf32, #tpu.memory_space<vmem>>, vector<32x32xf32>
    %cst_25 = arith.constant dense<0.000000e+00> : vector<32x32xf32>
    %27 = tpu.matmul %4, %4, %cst_25 {dimension_numbers = #tpu.dot_dimension_numbers<[0], [0], [1], [1], [0, 1, 1, 1], [], []>} : vector<16x32xf32>, vector<16x32xf32>, vector<32x32xf32> -> vector<32x32xf32>
    %28 = arith.addf %26, %27 : vector<32x32xf32>
    %c0_26 = arith.constant 0 : index
    %c0_27 = arith.constant 0 : index
    %29 = vector.load %arg8[%c0_26, %c0_27] : memref<32x32xf32, #tpu.memory_space<vmem>>, vector<32x32xf32>
    tpu.vector_store %arg8[%c0_26, %c0_27], %28 {strides = array<i32>} : memref<32x32xf32, #tpu.memory_space<vmem>>, vector<32x32xf32>,
    %c0_i32_28 = arith.constant 0 : i32
    %30 = arith.cmpi eq, %arg0, %c0_i32_28 : i32
    %31 = arith.extui %30 : i1 to i32
    %c0_i32_29 = arith.constant 0 : i32
    %32 = arith.cmpi ne, %31, %c0_i32_29 : i32
    scf.if %32 {
      %c0_30 = arith.constant 0 : index
      %c0_31 = arith.constant 0 : index
      %33 = vector.load %arg4[%c0_30, %c0_31] : memref<8x32xf32, #tpu.memory_space<vmem>>, vector<8x32xf32>
      %cst_32 = arith.constant dense<0.000000e+00> : vector<32xf32>
      %34 = vector.multi_reduction <add>, %33, %cst_32 [0] : vector<8x32xf32> to vector<32xf32>
      %35 = vector.shape_cast %34 : vector<32xf32> to vector<1x32xf32>
      %cst_33 = arith.constant 6.250000e-02 : f32
      %36 = vector.broadcast %cst_33 : f32 to vector<1x32xf32>
      %37 = arith.mulf %35, %36 : vector<1x32xf32>
      %c0_34 = arith.constant 0 : index
      %c0_35 = arith.constant 0 : index
      %38 = vector.load %arg7[%c0_34, %c0_35] : memref<32x32xf32, #tpu.memory_space<vmem>>, vector<32x32xf32>
      %39 = arith.mulf %38, %38 : vector<32x32xf32>
      %40 = vector.shape_cast %39 : vector<32x32xf32> to vector<1x32x32xf32>
      %cst_36 = arith.constant dense<0.000000e+00> : vector<1xf32>
      %41 = vector.multi_reduction <add>, %40, %cst_36 [1, 2] : vector<1x32x32xf32> to vector<1xf32>
      %42 = vector.shape_cast %41 : vector<1xf32> to vector<1x1x1xf32>
      %43 = vector.extract %42[0, 0, 0] : f32 from vector<1x1x1xf32>
      %44 = tpu.iota {dimensions = array<i32: 0>} : vector<32x32xi32>
      %45 = tpu.iota {dimensions = array<i32: 1>} : vector<32x32xi32>
      %46 = arith.cmpi eq, %44, %45 : vector<32x32xi32>
      %cst_37 = arith.constant 0.000000e+00 : f32
      %47 = vector.broadcast %cst_37 : f32 to vector<32x32xf32>
      %48 = arith.select %46, %38, %47 : vector<32x32xi1>, vector<32x32xf32>
      %cst_38 = arith.constant dense<0.000000e+00> : vector<32xf32>
      %49 = vector.multi_reduction <add>, %48, %cst_38 [0] : vector<32x32xf32> to vector<32xf32>
      %50 = vector.shape_cast %49 : vector<32xf32> to vector<1x32xf32>
      %cst_39 = arith.constant dense<0.000000e+00> : vector<1x32xf32>
      %51 = tpu.matmul %37, %38, %cst_39 {dimension_numbers = #tpu.dot_dimension_numbers<[1], [0], [0], [1], [0, 0, 1, 1], [], []>} : vector<1x32xf32>, vector<32x32xf32>, vector<1x32xf32> -> vector<1x32xf32>
      %cst_40 = arith.constant 1.600000e+01 : f32
      %52 = vector.broadcast %cst_40 : f32 to vector<1x32xf32>
      %53 = arith.mulf %52, %37 : vector<1x32xf32>
      %54 = arith.mulf %53, %37 : vector<1x32xf32>
      %55 = arith.subf %50, %54 : vector<1x32xf32>
      %56 = arith.mulf %51, %37 : vector<1x32xf32>
      %57 = vector.shape_cast %56 : vector<1x32xf32> to vector<1x1x32xf32>
      %cst_41 = arith.constant dense<0.000000e+00> : vector<1xf32>
      %58 = vector.multi_reduction <add>, %57, %cst_41 [1, 2] : vector<1x1x32xf32> to vector<1xf32>
      %59 = vector.shape_cast %58 : vector<1xf32> to vector<1x1x1xf32>
      %60 = vector.extract %59[0, 0, 0] : f32 from vector<1x1x1xf32>
      %61 = arith.mulf %37, %37 : vector<1x32xf32>
      %62 = vector.shape_cast %61 : vector<1x32xf32> to vector<1x1x32xf32>
      %cst_42 = arith.constant dense<0.000000e+00> : vector<1xf32>
      %63 = vector.multi_reduction <add>, %62, %cst_42 [1, 2] : vector<1x1x32xf32> to vector<1xf32>
      %64 = vector.shape_cast %63 : vector<1xf32> to vector<1x1x1xf32>
      %65 = vector.extract %64[0, 0, 0] : f32 from vector<1x1x1xf32>
      %cst_43 = arith.constant 3.200000e+01 : f32
      %66 = arith.mulf %cst_43, %60 : f32
      %67 = arith.subf %43, %66 : f32
      %cst_44 = arith.constant 1.600000e+01 : f32
      %68 = arith.mulf %cst_44, %65 : f32
      %69 = arith.mulf %68, %68 : f32
      %70 = arith.addf %67, %69 : f32
      %71 = arith.mulf %55, %55 : vector<1x32xf32>
      %72 = vector.shape_cast %71 : vector<1x32xf32> to vector<1x1x32xf32>
      %cst_45 = arith.constant dense<0.000000e+00> : vector<1xf32>
      %73 = vector.multi_reduction <add>, %72, %cst_45 [1, 2] : vector<1x1x32xf32> to vector<1xf32>
      %74 = vector.shape_cast %73 : vector<1xf32> to vector<1x1x1xf32>
      %75 = vector.extract %74[0, 0, 0] : f32 from vector<1x1x1xf32>
      %76 = arith.subf %70, %75 : f32
      %c0_46 = arith.constant 0 : index
      %c0_47 = arith.constant 0 : index
      %77 = vector.load %arg5[%c0_46, %c0_47] : memref<8x32xf32, #tpu.memory_space<vmem>>, vector<8x32xf32>
      %cst_48 = arith.constant dense<0.000000e+00> : vector<32xf32>
      %78 = vector.multi_reduction <add>, %77, %cst_48 [0] : vector<8x32xf32> to vector<32xf32>
      %79 = vector.shape_cast %78 : vector<32xf32> to vector<1x32xf32>
      %cst_49 = arith.constant 6.250000e-02 : f32
      %80 = vector.broadcast %cst_49 : f32 to vector<1x32xf32>
      %81 = arith.mulf %79, %80 : vector<1x32xf32>
      %c0_50 = arith.constant 0 : index
      %c0_51 = arith.constant 0 : index
      %82 = vector.load %arg8[%c0_50, %c0_51] : memref<32x32xf32, #tpu.memory_space<vmem>>, vector<32x32xf32>
      %83 = arith.mulf %82, %82 : vector<32x32xf32>
      %84 = vector.shape_cast %83 : vector<32x32xf32> to vector<1x32x32xf32>
      %cst_52 = arith.constant dense<0.000000e+00> : vector<1xf32>
      %85 = vector.multi_reduction <add>, %84, %cst_52 [1, 2] : vector<1x32x32xf32> to vector<1xf32>
      %86 = vector.shape_cast %85 : vector<1xf32> to vector<1x1x1xf32>
      %87 = vector.extract %86[0, 0, 0] : f32 from vector<1x1x1xf32>
      %88 = tpu.iota {dimensions = array<i32: 0>} : vector<32x32xi32>
      %89 = tpu.iota {dimensions = array<i32: 1>} : vector<32x32xi32>
      %90 = arith.cmpi eq, %88, %89 : vector<32x32xi32>
      %cst_53 = arith.constant 0.000000e+00 : f32
      %91 = vector.broadcast %cst_53 : f32 to vector<32x32xf32>
      %92 = arith.select %90, %82, %91 : vector<32x32xi1>, vector<32x32xf32>
      %cst_54 = arith.constant dense<0.000000e+00> : vector<32xf32>
      %93 = vector.multi_reduction <add>, %92, %cst_54 [0] : vector<32x32xf32> to vector<32xf32>
      %94 = vector.shape_cast %93 : vector<32xf32> to vector<1x32xf32>
      %cst_55 = arith.constant dense<0.000000e+00> : vector<1x32xf32>
      %95 = tpu.matmul %81, %82, %cst_55 {dimension_numbers = #tpu.dot_dimension_numbers<[1], [0], [0], [1], [0, 0, 1, 1], [], []>} : vector<1x32xf32>, vector<32x32xf32>, vector<1x32xf32> -> vector<1x32xf32>
      %cst_56 = arith.constant 1.600000e+01 : f32
      %96 = vector.broadcast %cst_56 : f32 to vector<1x32xf32>
      %97 = arith.mulf %96, %81 : vector<1x32xf32>
      %98 = arith.mulf %97, %81 : vector<1x32xf32>
      %99 = arith.subf %94, %98 : vector<1x32xf32>
      %100 = arith.mulf %95, %81 : vector<1x32xf32>
      %101 = vector.shape_cast %100 : vector<1x32xf32> to vector<1x1x32xf32>
      %cst_57 = arith.constant dense<0.000000e+00> : vector<1xf32>
      %102 = vector.multi_reduction <add>, %101, %cst_57 [1, 2] : vector<1x1x32xf32> to vector<1xf32>
      %103 = vector.shape_cast %102 : vector<1xf32> to vector<1x1x1xf32>
      %104 = vector.extract %103[0, 0, 0] : f32 from vector<1x1x1xf32>
      %105 = arith.mulf %81, %81 : vector<1x32xf32>
      %106 = vector.shape_cast %105 : vector<1x32xf32> to vector<1x1x32xf32>
      %cst_58 = arith.constant dense<0.000000e+00> : vector<1xf32>
      %107 = vector.multi_reduction <add>, %106, %cst_58 [1, 2] : vector<1x1x32xf32> to vector<1xf32>
      %108 = vector.shape_cast %107 : vector<1xf32> to vector<1x1x1xf32>
      %109 = vector.extract %108[0, 0, 0] : f32 from vector<1x1x1xf32>
      %cst_59 = arith.constant 3.200000e+01 : f32
      %110 = arith.mulf %cst_59, %104 : f32
      %111 = arith.subf %87, %110 : f32
      %cst_60 = arith.constant 1.600000e+01 : f32
      %112 = arith.mulf %cst_60, %109 : f32
      %113 = arith.mulf %112, %112 : f32
      %114 = arith.addf %111, %113 : f32
      %115 = arith.mulf %99, %99 : vector<1x32xf32>
      %116 = vector.shape_cast %115 : vector<1x32xf32> to vector<1x1x32xf32>
      %cst_61 = arith.constant dense<0.000000e+00> : vector<1xf32>
      %117 = vector.multi_reduction <add>, %116, %cst_61 [1, 2] : vector<1x1x32xf32> to vector<1xf32>
      %118 = vector.shape_cast %117 : vector<1xf32> to vector<1x1x1xf32>
      %119 = vector.extract %118[0, 0, 0] : f32 from vector<1x1x1xf32>
      %120 = arith.subf %114, %119 : f32
      %c0_62 = arith.constant 0 : index
      %c0_63 = arith.constant 0 : index
      %121 = vector.load %arg6[%c0_62, %c0_63] : memref<8x32xf32, #tpu.memory_space<vmem>>, vector<8x32xf32>
      %122 = vector.shape_cast %121 : vector<8x32xf32> to vector<1x8x32xf32>
      %cst_64 = arith.constant dense<0.000000e+00> : vector<1xf32>
      %123 = vector.multi_reduction <add>, %122, %cst_64 [1, 2] : vector<1x8x32xf32> to vector<1xf32>
      %124 = vector.shape_cast %123 : vector<1xf32> to vector<1x1x1xf32>
      %125 = vector.extract %124[0, 0, 0] : f32 from vector<1x1x1xf32>
      %cst_65 = arith.constant 0.001953125 : f32
      %126 = arith.mulf %125, %cst_65 : f32
      %cst_66 = arith.constant 0.0666666701 : f32
      %127 = vector.broadcast %cst_66 : f32 to vector<1x32xf32>
      %128 = arith.mulf %55, %127 : vector<1x32xf32>
      %cst_67 = arith.constant 9.99999974E-5 : f32
      %129 = vector.broadcast %cst_67 : f32 to vector<1x32xf32>
      %130 = arith.addf %128, %129 : vector<1x32xf32>
      %131 = math.sqrt %130 : vector<1x32xf32>
      %cst_68 = arith.constant 0.0666666701 : f32
      %132 = vector.broadcast %cst_68 : f32 to vector<1x32xf32>
      %133 = arith.mulf %99, %132 : vector<1x32xf32>
      %cst_69 = arith.constant 9.99999974E-5 : f32
      %134 = vector.broadcast %cst_69 : f32 to vector<1x32xf32>
      %135 = arith.addf %133, %134 : vector<1x32xf32>
      %136 = math.sqrt %135 : vector<1x32xf32>
      %cst_70 = arith.constant 1.000000e+00 : f32
      %137 = vector.broadcast %cst_70 : f32 to vector<1x32xf32>
      %138 = arith.subf %137, %131 : vector<1x32xf32>
      %cst_71 = arith.constant 0.000000e+00 : f32
      %139 = vector.broadcast %cst_71 : f32 to vector<1x32xf32>
      %140 = arith.maximumf %138, %139 : vector<1x32xf32>
      %141 = vector.shape_cast %140 : vector<1x32xf32> to vector<1x1x32xf32>
      %cst_72 = arith.constant dense<0.000000e+00> : vector<1xf32>
      %142 = vector.multi_reduction <add>, %141, %cst_72 [1, 2] : vector<1x1x32xf32> to vector<1xf32>
      %143 = vector.shape_cast %142 : vector<1xf32> to vector<1x1x1xf32>
      %144 = vector.extract %143[0, 0, 0] : f32 from vector<1x1x1xf32>
      %cst_73 = arith.constant 1.000000e+00 : f32
      %145 = vector.broadcast %cst_73 : f32 to vector<1x32xf32>
      %146 = arith.subf %145, %136 : vector<1x32xf32>
      %cst_74 = arith.constant 0.000000e+00 : f32
      %147 = vector.broadcast %cst_74 : f32 to vector<1x32xf32>
      %148 = arith.maximumf %146, %147 : vector<1x32xf32>
      %149 = vector.shape_cast %148 : vector<1x32xf32> to vector<1x1x32xf32>
      %cst_75 = arith.constant dense<0.000000e+00> : vector<1xf32>
      %150 = vector.multi_reduction <add>, %149, %cst_75 [1, 2] : vector<1x1x32xf32> to vector<1xf32>
      %151 = vector.shape_cast %150 : vector<1xf32> to vector<1x1x1xf32>
      %152 = vector.extract %151[0, 0, 0] : f32 from vector<1x1x1xf32>
      %153 = arith.addf %144, %152 : f32
      %cst_76 = arith.constant 1.562500e-02 : f32
      %154 = arith.mulf %cst_76, %153 : f32
      %155 = arith.addf %76, %120 : f32
      %cst_77 = arith.constant 1.38888892E-4 : f32
      %156 = arith.mulf %155, %cst_77 : f32
      %cst_78 = arith.constant 2.500000e+01 : f32
      %157 = arith.mulf %cst_78, %126 : f32
      %cst_79 = arith.constant 2.500000e+01 : f32
      %158 = arith.mulf %cst_79, %154 : f32
      %159 = arith.addf %157, %158 : f32
      %cst_80 = arith.constant 1.000000e+00 : f32
      %160 = arith.mulf %cst_80, %156 : f32
      %161 = arith.addf %159, %160 : f32
      %c0_81 = arith.constant 0 : index
      %c0_82 = arith.constant 0 : index
      %162 = memref.load %arg3[%c0_81, %c0_82] : memref<1x1xf32, #tpu.memory_space<smem>>
      memref.store %161, %arg3[%c0_81, %c0_82] : memref<1x1xf32, #tpu.memory_space<smem>>
    } else {
    }
    return
  }
  func.func @transform_0(%arg0: i32) -> (i32, i32) {
    %c0_i32 = arith.constant 0 : i32
    %c0_i32_0 = arith.constant 0 : i32
    return %arg0, %c0_i32 : i32, i32
  }
  func.func @transform_1(%arg0: i32) -> (i32, i32) {
    %c0_i32 = arith.constant 0 : i32
    %c0_i32_0 = arith.constant 0 : i32
    return %arg0, %c0_i32 : i32, i32
  }
  func.func @transform_2(%arg0: i32) -> (i32, i32) {
    %c0_i32 = arith.constant 0 : i32
    %c0_i32_0 = arith.constant 0 : i32
    %c0_i32_1 = arith.constant 0 : i32
    return %c0_i32, %c0_i32_0 : i32, i32
  }
}

</mosaic_0001>

<bundles_post_ra>
// kernel: tpu_custom_call.1
= control target key start
LH: loop header
LB: loop body
LE: loop exit
PB: predicated region body
PF: predicated region fallthrough
CT: control target
= control target key end

     0   :  { %7 = vsyncpa [#allocation8], 0  ;;  %s1139_s0 = inlined_call_operand.hbm [shape: f32[16,32], index: 0, kind: input, shape index: {}]   ;;  %s1140_s1 = inlined_call_operand.hbm [shape: f32[16,32], index: 1, kind: input, shape index: {}]   ;;  %s1141_s2 = inlined_call_operand.hbm [shape: f32[1,1], index: 2, kind: output, shape index: {}]  }
   0x1   :  { %8 = vsyncpa [#allocation11], 0 }
   0x2   :  { %9 = vsyncpa [#allocation9], 0  ;;  %s978_s9 = smov [#allocation7]   ;;  %s918_s13 = scalar_lea.hbm %s1139_s0, 256 }
   0x3   :  { %s15_s10 = sshll.u32 %s978_s9, 4  ;;  %p919_p0 = scmp.ne.s32.totalorder %s1139_s0, %s918_s13  ;;  %s16_s10 = int_to_ptr.vmem [resolvable:$true] %s15_s10 }
   0x4   :  { %p922_p1 = scmp.lt.u32.totalorder %s918_s13, %s1139_s0 }
   0x6   :  { %p924_p2 = pnand %p922_p1, %p919_p0 }
   0x8   :  { %927 = shalt.err (!%p924_p2)
}
   0x9   :  { %s928_s18 = scalar_lea.vmem %s16_s10, 256  ;;  %p933_p4 = scmp.lt.s32.totalorder %s16_s10, %s16_s10 }
   0xa   :  { %p929_p3 = scmp.ne.s32.totalorder %s16_s10, %s928_s18  ;;  %p934_p5 = scmp.lt.s32.totalorder %s928_s18, %s928_s18 }
   0xc   :  { %p935_p6 = por %p934_p5, %p933_p4 }
   0xe   :  { %p936_p7 = pnand %p935_p6, %p929_p3 }
  0x10   :  { %939 = shalt.err (!%p936_p7)
}
  0x11   :  { %s979_s19 = smov 128   ;;  %s980_s20 = smov 8  }
  0x12   :  { %21 = dma.hbm_to_vmem [thread:$0]  %s1139_s0, 256, %s16_s10, [#allocation8], %s979_s19, %s979_s19, %s980_s20  }
  0x13   :  { %s981_s23 = smov [#allocation10]   ;;  %s940_s27 = scalar_lea.hbm %s1140_s1, 256 }
  0x14   :  { %s27_s24 = sshll.u32 %s981_s23, 4  ;;  %p941_p8 = scmp.ne.s32.totalorder %s1140_s1, %s940_s27  ;;  %s28_s24 = int_to_ptr.vmem [resolvable:$true] %s27_s24 }
  0x15   :  { %p944_p9 = scmp.lt.u32.totalorder %s940_s27, %s1140_s1 }
  0x17   :  { %p946_p10 = pnand %p944_p9, %p941_p8 }
  0x19   :  { %949 = shalt.err (!%p946_p10)
}
  0x1a   :  { %s950_s4 = scalar_lea.vmem %s28_s24, 256  ;;  %p955_p12 = scmp.lt.s32.totalorder %s28_s24, %s28_s24 }
  0x1b   :  { %p951_p11 = scmp.ne.s32.totalorder %s28_s24, %s950_s4  ;;  %p956_p13 = scmp.lt.s32.totalorder %s950_s4, %s950_s4 }
  0x1d   :  { %p957_p0 = por %p956_p13, %p955_p12 }
  0x1f   :  { %p958_p1 = pnand %p957_p0, %p951_p11 }
  0x21   :  { %961 = shalt.err (!%p958_p1)
}
  0x22   :  { %33 = dma.hbm_to_vmem [thread:$0]  %s1140_s1, 256, %s28_s24, [#allocation11], %s979_s19, %s979_s19, %s980_s20  }
  0x23   :  { %972 = dma.done.wait [#allocation8], 256  }
  0x24   :  { %973 = vsyncadd [#allocation8], 4294967040 }
  0x25   :  { %974 = dma.done.wait [#allocation11], 256  }
  0x26   :  { %975 = vsyncadd [#allocation11], 4294967040  ;;  %vm44_vm0 = vcmask 261120   ;;  %v982_v0 = vmov 0.0   ;;  %v58_v1 = vld [vmem:[#allocation10] sm:$0xff]  ;;  %v56_v2 = vld [vmem:[#allocation7] sm:$0xff]  ;;  %v402_v59 = vlaneseq }
  0x27   :  { %46 = vst.msk [vmem:[#allocation3] sm:$0xff] %vm44_vm0, %v982_v0  ;;  %45 = vst.msk [vmem:[#allocation2] sm:$0xff] %vm44_vm0, %v982_v0  ;;  %v59_v3 = vld [vmem:[#allocation10 + $0x8] sm:$0xff]  ;;  %229 = vxpose.xlu1.b32.start [1/2] (short) (narrow) %v58_v1, 32  ;;  %v70_v4 = vsel %vm44_vm0, %v58_v1, 0.0  ;;  %87 = vxpose.xlu0.b32.start [1/2] (short) (narrow) %v56_v2, 32  ;;  %v60_v5 = vsub.f32 %v56_v2, %v58_v1 }
  0x28   :  { %47 = vst.msk [vmem:[#allocation4] sm:$0xff] %vm44_vm0, %v982_v0  ;;  %48 = vst.msk [vmem:[#allocation5] sm:$0xff] %vm44_vm0, %v982_v0  ;;  %v64_v6 = vsel %vm44_vm0, %v56_v2, 0.0  ;;  %v71_v7 = vsel %vm44_vm0, %v59_v3, 0.0  ;;  %v57_v10 = vld [vmem:[#allocation7 + $0x8] sm:$0xff]  ;;  %v868_v18 = vpack.c.bf16 %v59_v3, %v58_v1  ;;  %vm119_vm1 = vcmask 130048  }
  0x29   :  { %49 = vst.msk [vmem:[#allocation5 + $0x8] sm:$0xff] %vm44_vm0, %v982_v0  ;;  %50 = vst.msk [vmem:[#allocation5 + $0x10] sm:$0xff] %vm44_vm0, %v982_v0  ;;  %v72_v9 = vadd.f32 %v71_v7, %v70_v4  ;;  %v75_v11 = vmul.f32 %v60_v5, %v60_v5  ;;  %v61_v12 = vsub.f32 %v57_v10, %v59_v3  ;;  %v65_v13 = vsel %vm44_vm0, %v57_v10, 0.0 }
  0x2a   :  { %51 = vst.msk [vmem:[#allocation5 + $0x18] sm:$0xff] %vm44_vm0, %v982_v0  ;;  %52 = vst.msk [vmem:[#allocation6] sm:$0xff] %vm44_vm0, %v982_v0  ;;  %v864_v15 = vpack.c.bf16 %v57_v10, %v56_v2  ;;  %v66_v17 = vadd.f32 %v65_v13, %v64_v6  ;;  %869 = vmatprep.subr.bf16.mxu1 %v868_v18  ;;  %v983_v42 = vmov 0.0|0.0   ;;  %vm507_vm2 = vcmask 253952  }
  0x2b   :  { %53 = vst.msk [vmem:[#allocation6 + $0x8] sm:$0xff] %vm44_vm0, %v982_v0  ;;  %54 = vst.msk [vmem:[#allocation6 + $0x10] sm:$0xff] %vm44_vm0, %v982_v0  ;;  %v78_v19 = vsel %vm44_vm0, %v75_v11, 0.0  ;;  %230 = vxpose.xlu1.b32.end [2/2] (short) (narrow) %v59_v3, 32  ;;  %v76_v20 = vmul.f32 %v61_v12, %v61_v12  ;;  %88 = vxpose.xlu0.b32.end [2/2] (short) (narrow) %v57_v10, 32  ;;  %vm984_vm3 = vmmov 0  }
  0x2c   :  { %55 = vst.msk [vmem:[#allocation6 + $0x18] sm:$0xff] %vm44_vm0, %v982_v0  ;;  %865 = vmatprep.subr.bf16.mxu0 %v864_v15  ;;  %871 = vmatpush3.bf16.msra.mxu1 %v868_v18  ;;  %v403_v3 = vshrl.u32 %v402_v59, 7  ;;  %v408_v10 = vand.u32 127, %v402_v59 }
  0x2d   :  { %v79_v22 = vsel %vm44_vm0, %v76_v20, 0.0  ;;  %867 = vmatpush3.bf16.msra.mxu0 %v864_v15  ;;  %878 = vmatprep.subr.bf16.mxu1 %v983_v42 }
  0x2e   :  { %v69_v8 = vld [vmem:[#allocation3] sm:$0xff]  ;;  %v62_v14 = vld [vmem:[#allocation2] sm:$0xff]  ;;  %v80_v24 = vadd.f32 %v79_v22, %v78_v19  ;;  %872 = vmatprep.subr.bf16.mxu0 %v983_v42  ;;  %vm409_vm5 = vcmp.eq.s32.totalorder %v403_v3, %v408_v10 }
  0x2f   :  { %v73_v16 = vadd.f32 %v72_v9, %v69_v8  ;;  %v67_v21 = vadd.f32 %v66_v17, %v62_v14  ;;  %v77_v23 = vld [vmem:[#allocation4] sm:$0xff]  ;;  %v83_v62 = vld [vmem:[#allocation5] sm:$0xff]  ;;  %v404_v9 = vadd.s32 8, %v403_v3 }
  0x30   :  { %v81_v25 = vadd.f32 %v80_v24, %v77_v23  ;;  %v84_v60 = vld [vmem:[#allocation5 + $0x8] sm:$0xff]  ;;  %v85_v13 = vld [vmem:[#allocation5 + $0x10] sm:$0xff] }
  0x31   :  { %74 = vst.msk [vmem:[#allocation3] sm:$0xff] %vm44_vm0, %v73_v16  ;;  %68 = vst.msk [vmem:[#allocation2] sm:$0xff] %vm44_vm0, %v67_v21  ;;  %v225_v63 = vld [vmem:[#allocation6] sm:$0xff]  ;;  %v86_v11 = vld [vmem:[#allocation5 + $0x18] sm:$0xff]  ;;  %vm410_vm4 = vcmp.eq.s32.totalorder %v404_v9, %v408_v10 }
  0x32   :  { %82 = vst.msk [vmem:[#allocation4] sm:$0xff] %vm44_vm0, %v81_v25  ;;  %v226_v61 = vld [vmem:[#allocation6 + $0x8] sm:$0xff]  ;;  %v227_v14 = vld [vmem:[#allocation6 + $0x10] sm:$0xff] }
  0x33   :  { %v228_v12 = vld [vmem:[#allocation6 + $0x18] sm:$0xff] }
  0x38   :  { %v546_v34 = vld [vmem:[#allocation3] sm:$0xff]  ;;  %v369_v38 = vld [vmem:[#allocation2] sm:$0xff] }
  0x39   :  { %v547_v35 = vsel %vm44_vm0, %v546_v34, 0.0  ;;  %v370_v39 = vsel %vm44_vm0, %v369_v38, 0.0  ;;  %v711_v45 = vld [vmem:[#allocation4] sm:$0xff]  ;;  %v406_v34 = vadd.s32 24, %v403_v3 }
  0x3a   :  { %v548_v36 = vrot.slane %v547_v35, 4  ;;  %v371_v41 = vrot.slane %v370_v39, 4  ;;  %v712_v48 = vsel %vm44_vm0, %v711_v45, 0.0 }
  0x3b   :  { %vm412_vm7 = vcmp.eq.s32.totalorder %v406_v34, %v408_v10 }
  0x3c   :  { %v549_v37 = vadd.f32 %v548_v36, %v547_v35  ;;  %v372_v44 = vadd.f32 %v371_v41, %v370_v39 }
  0x3e   :  { %v550_v40 = vrot.slane %v549_v37, 2  ;;  %v373_v47 = vrot.slane %v372_v44, 2 }
  0x40   :  { %v551_v43 = vadd.f32 %v550_v40, %v549_v37  ;;  %v374_v51 = vadd.f32 %v373_v47, %v372_v44 }
  0x42   :  { %v552_v46 = vrot.slane %v551_v43, 1  ;;  %v375_v54 = vrot.slane %v374_v51, 1 }
  0x44   :  { %v553_v49 = vadd.f32 %v552_v46, %v551_v43  ;;  %v376_v55 = vadd.f32 %v375_v54, %v374_v51 }
  0x46   :  { %v1069_v50 = vmul.f32 0.0625, %v553_v49  ;;  %v1076_v56 = vmul.f32 0.0625, %v376_v55 }
  0x48   :  { %v683_v52 = vmul.f32 %v1069_v50, %v1069_v50  ;;  %v518_v57 = vmul.f32 %v1076_v56, %v1076_v56 }
  0x4a   :  { %v684_v53 = vsel %vm507_vm2, %v683_v52, 0.0  ;;  %v519_v58 = vsel %vm507_vm2, %v518_v57, 0.0 }
  0x5a   :  { %520 = vadd.xlane.f32.xlu1 %v519_v58 }
  0x60   :  { %713 = vadd.xlane.f32.xlu0 %v712_v48 }
  0x64   :  { %685 = vadd.xlane.f32.xlu0 %v684_v53 }
  0xa7   :  { %v245_v26 = vpop.trf.xlu1  ;;  %v103_v27 = vpop.trf.xlu0 }
  0xa8   :  { %826 = vmatprep.mubr.msk.f32.mxu0 %vm119_vm1, %v103_v27  ;;  %836 = vmatprep.mubr.msk.f32.mxu1 %vm119_vm1, %v245_v26 }
  0xab   :  { %v246_v28 = vpop.trf.xlu1  ;;  %v104_v29 = vpop.trf.xlu0 }
  0xac   :  { %827 = vmatmul.mubr.msk.f32.vlgmr.msra.gmra.mrb[0].mxu0 %vm119_vm1, %v104_v29  ;;  %837 = vmatmul.mubr.msk.f32.vlgmr.msra.gmra.mrb[0].mxu1 %vm119_vm1, %v246_v28 }
  0xaf   :  { %v247_v30 = vpop.trf.xlu1  ;;  %v105_v31 = vpop.trf.xlu0 }
  0xb0   :  { %829 = vmatprep.mubr.msk.f32.mxu0 %vm119_vm1, %v105_v31  ;;  %839 = vmatprep.mubr.msk.f32.mxu1 %vm119_vm1, %v247_v30 }
  0xb3   :  { %v248_v32 = vpop.trf.xlu1  ;;  %v106_v33 = vpop.trf.xlu0 }
  0xb4   :  { %830 = vmatmul.mubr.msk.f32.gmra.mrb[2].mxu0 %vm119_vm1, %v106_v33  ;;  %840 = vmatmul.mubr.msk.f32.gmra.mrb[2].mxu1 %vm119_vm1, %v248_v32  ;;  %v405_v33 = vadd.s32 16, %v403_v3 }
  0xb5   :  { %850 = vmatprep.mubr.msk.f32.mxu0 %vm984_vm3, %v982_v0  ;;  %861 = vmatprep.mubr.msk.f32.mxu1 %vm984_vm3, %v982_v0 }
  0xb6   :  { %vm411_vm6 = vcmp.eq.s32.totalorder %v405_v33, %v408_v10 }
 0x17f   :  { %v828_v1 = vpop.f32.mrb[0].mxu0  ;;  %v838_v2 = vpop.f32.mrb[0].mxu1 }
 0x180   :  { %v218_v4 = vadd.f32 %v828_v1, %v84_v60  ;;  %v198_v0 = vpop.f32.mrb[1].mxu0  ;;  %v359_v5 = vadd.f32 %v838_v2, %v226_v61  ;;  %v339_v6 = vpop.f32.mrb[1].mxu1 }
 0x181   :  { %v217_v7 = vadd.f32 %v198_v0, %v83_v62  ;;  %v358_v8 = vadd.f32 %v339_v6, %v225_v63 }
 0x182   :  { %222 = vst.msk [vmem:[#allocation5 + $0x8] sm:$0xff] %vm44_vm0, %v218_v4  ;;  %363 = vst.msk [vmem:[#allocation6 + $0x8] sm:$0xff] %vm44_vm0, %v359_v5 }
 0x183   :  { %221 = vst.msk [vmem:[#allocation5] sm:$0xff] %vm44_vm0, %v217_v7  ;;  %362 = vst.msk [vmem:[#allocation6] sm:$0xff] %vm44_vm0, %v358_v8 }
 0x187   :  { %v831_v15 = vpop.f32.mrb[2].mxu0  ;;  %v841_v16 = vpop.f32.mrb[2].mxu1 }
 0x188   :  { %v220_v17 = vadd.f32 %v831_v15, %v86_v11  ;;  %v361_v18 = vadd.f32 %v841_v16, %v228_v12  ;;  %v208_v19 = vpop.f32.mrb[3].mxu0  ;;  %v349_v20 = vpop.f32.mrb[3].mxu1 }
 0x189   :  { %v219_v21 = vadd.f32 %v208_v19, %v85_v13  ;;  %v360_v22 = vadd.f32 %v349_v20, %v227_v14  ;;  %v379_v23 = vld [vmem:[#allocation5 + $0x8] sm:$0xff] }
 0x18a   :  { %v556_v24 = vld [vmem:[#allocation6 + $0x8] sm:$0xff]  ;;  %224 = vst.msk [vmem:[#allocation5 + $0x18] sm:$0xff] %vm44_vm0, %v220_v17  ;;  %365 = vst.msk [vmem:[#allocation6 + $0x18] sm:$0xff] %vm44_vm0, %v361_v18  ;;  %v378_v25 = vld [vmem:[#allocation5] sm:$0xff]  ;;  %v414_v26 = vsel %vm410_vm4, %v379_v23, 0.0  ;;  %v383_v37 = vmul.f32 %v379_v23, %v379_v23 }
 0x18b   :  { %v555_v27 = vld [vmem:[#allocation6] sm:$0xff]  ;;  %223 = vst.msk [vmem:[#allocation5 + $0x10] sm:$0xff] %vm44_vm0, %v219_v21  ;;  %364 = vst.msk [vmem:[#allocation6 + $0x10] sm:$0xff] %vm44_vm0, %v360_v22  ;;  %v413_v28 = vsel %vm409_vm5, %v378_v25, 0.0  ;;  %v873_v29 = vpack.c.bf16 %v379_v23, %v378_v25  ;;  %v580_v31 = vsel %vm410_vm4, %v556_v24, 0.0  ;;  %v418_v36 = vsel %vm44_vm0, %v414_v26, 0.0 }
 0x18c   :  { %v579_v30 = vsel %vm409_vm5, %v555_v27, 0.0  ;;  %v879_v32 = vpack.c.bf16 %v556_v24, %v555_v27  ;;  %v417_v35 = vsel %vm44_vm0, %v413_v28, 0.0  ;;  %v560_v38 = vmul.f32 %v556_v24, %v556_v24 }
 0x18d   :  { %874 = vmatpush3.bf16.msra.mxu0 %v873_v29  ;;  %v583_v39 = vsel %vm44_vm0, %v579_v30, 0.0  ;;  %v584_v40 = vsel %vm44_vm0, %v580_v31, 0.0  ;;  %v382_v41 = vmul.f32 %v378_v25, %v378_v25  ;;  %v559_v43 = vmul.f32 %v555_v27, %v555_v27 }
 0x18e   :  { %880 = vmatpush3.bf16.msra.mxu1 %v879_v32  ;;  %875 = vmatprep.subr.bf16.mxu0 %v983_v42  ;;  %v419_v44 = vadd.f32 %v418_v36, %v417_v35  ;;  %v585_v45 = vadd.f32 %v584_v40, %v583_v39  ;;  %v387_v48 = vsel %vm44_vm0, %v383_v37, 0.0  ;;  %v564_v55 = vsel %vm44_vm0, %v560_v38, 0.0 }
 0x18f   :  { %881 = vmatprep.subr.bf16.mxu1 %v983_v42  ;;  %v386_v53 = vsel %vm44_vm0, %v382_v41, 0.0  ;;  %v563_v54 = vsel %vm44_vm0, %v559_v43, 0.0  ;;  %v503_v23 = vmul.f32 16.0, %v1076_v56  ;;  %v669_v25 = vmul.f32 16.0, %v1069_v50 }
 0x190   :  { %v388_v5 = vadd.f32 %v387_v48, %v386_v53  ;;  %v565_v12 = vadd.f32 %v564_v55, %v563_v54  ;;  %v714_v53 = vpop.xlane.xlu0 %713 }
 0x191   :  { %v381_v46 = vld [vmem:[#allocation5 + $0x18] sm:$0xff]  ;;  %v504_v30 = vmul.f32 %v503_v23, %v1076_v56  ;;  %v670_v32 = vmul.f32 %v669_v25, %v1069_v50 }
 0x192   :  { %v558_v47 = vld [vmem:[#allocation6 + $0x18] sm:$0xff]  ;;  %v380_v49 = vld [vmem:[#allocation5 + $0x10] sm:$0xff]  ;;  %v416_v42 = vsel %vm412_vm7, %v381_v46, 0.0  ;;  %v385_v4 = vmul.f32 %v381_v46, %v381_v46 }
 0x193   :  { %v557_v51 = vld [vmem:[#allocation6 + $0x10] sm:$0xff]  ;;  %v582_v52 = vsel %vm412_vm7, %v558_v47, 0.0  ;;  %v415_v57 = vsel %vm411_vm6, %v380_v49, 0.0  ;;  %v876_v58 = vpack.c.bf16 %v381_v46, %v380_v49  ;;  %v384_v3 = vmul.f32 %v380_v49, %v380_v49 }
 0x194   :  { %v581_v59 = vsel %vm411_vm6, %v557_v51, 0.0  ;;  %v420_v60 = vsel %vm44_vm0, %v415_v57, 0.0  ;;  %v588_v62 = vsel %vm44_vm0, %v582_v52, 0.0  ;;  %v882_v63 = vpack.c.bf16 %v558_v47, %v557_v51  ;;  %v686_v54 = vpop.xlane.xlu0 %685 }
 0x195   :  { %v586_v61 = vsel %vm44_vm0, %v581_v59, 0.0  ;;  %v421_v1 = vadd.f32 %v420_v60, %v419_v44  ;;  %877 = vmatpush3.bf16.msra.mxu0 %v876_v58  ;;  %v422_v0 = vsel %vm44_vm0, %v416_v42, 0.0  ;;  %v561_v6 = vmul.f32 %v557_v51, %v557_v51 }
 0x196   :  { %v587_v2 = vadd.f32 %v586_v61, %v585_v45  ;;  %883 = vmatpush3.bf16.msra.mxu1 %v882_v63  ;;  %v389_v7 = vsel %vm44_vm0, %v384_v3, 0.0  ;;  %v562_v8 = vmul.f32 %v558_v47, %v558_v47  ;;  %v391_v14 = vsel %vm44_vm0, %v385_v4, 0.0 }
 0x197   :  { %v423_v9 = vadd.f32 %v422_v0, %v421_v1  ;;  %v390_v11 = vadd.f32 %v389_v7, %v388_v5  ;;  %v566_v13 = vsel %vm44_vm0, %v561_v6, 0.0 }
 0x198   :  { %v589_v10 = vadd.f32 %v588_v62, %v587_v2  ;;  %851 = vmatmul.mubr.msk.f32.vlgmr.msra.gmra.mrb[4].mxu0 %vm44_vm0, %v1076_v56  ;;  %v567_v18 = vadd.f32 %v566_v13, %v565_v12  ;;  %v568_v19 = vsel %vm44_vm0, %v562_v8, 0.0 }
 0x199   :  { %862 = vmatmul.mubr.msk.f32.vlgmr.msra.gmra.mrb[4].mxu1 %vm44_vm0, %v1069_v50  ;;  %v424_v15 = vrot.slane %v423_v9, 4  ;;  %v392_v17 = vadd.f32 %v391_v14, %v390_v11 }
 0x19a   :  { %v590_v16 = vrot.slane %v589_v10, 4  ;;  %v569_v26 = vadd.f32 %v568_v19, %v567_v18 }
 0x19b   :  { %v425_v20 = vadd.f32 %v424_v15, %v423_v9  ;;  %393 = vadd.xlane.f32.xlu0 %v392_v17 }
 0x19c   :  { %v591_v21 = vadd.f32 %v590_v16, %v589_v10  ;;  %v521_v16 = vpop.xlane.xlu1 %520 }
 0x19d   :  { %v426_v22 = vrot.slane %v425_v20, 2 }
 0x19e   :  { %v592_v24 = vrot.slane %v591_v21, 2 }
 0x19f   :  { %v427_v27 = vadd.f32 %v426_v22, %v425_v20  ;;  %570 = vadd.xlane.f32.xlu0 %v569_v26  ;;  %v715_v26 = vrot.slane %v714_v53, 4 }
 0x1a0   :  { %v593_v28 = vadd.f32 %v592_v24, %v591_v21 }
 0x1a1   :  { %v428_v29 = vrot.slane %v427_v27, 1 }
 0x1a2   :  { %v594_v31 = vrot.slane %v593_v28, 1 }
 0x1a3   :  { %v429_v33 = vadd.f32 %v428_v29, %v427_v27 }
 0x1a4   :  { %v595_v34 = vadd.f32 %v594_v31, %v593_v28 }
 0x1a5   :  { %v505_v35 = vsub.f32 %v429_v33, %v504_v30 }
 0x1a6   :  { %v671_v36 = vsub.f32 %v595_v34, %v670_v32 }
 0x1a7   :  { %v534_v37 = vmul.f32 %v505_v35, %v505_v35  ;;  %v723_v62 = vmul.f32 0.06666667, %v505_v35  ;;  %v716_v35 = vadd.f32 %v715_v26, %v714_v53 }
 0x1a8   :  { %v732_v38 = vmul.f32 0.06666667, %v671_v36  ;;  %v699_v40 = vmul.f32 %v671_v36, %v671_v36 }
 0x1a9   :  { %v535_v39 = vsel %vm507_vm2, %v534_v37, 0.0  ;;  %v724_v63 = vadd.f32 0.0001, %v723_v62 }
 0x1aa   :  { %v733_v41 = vadd.f32 0.0001, %v732_v38  ;;  %536 = vadd.xlane.f32.xlu1 %v535_v39  ;;  %v700_v43 = vsel %vm507_vm2, %v699_v40, 0.0 }
 0x1ab   :  { %vm727_vm10 = vcmp.eq.f32.partialorder %v724_v63, inf  ;;  %v730_v4 = vand.u32 2147483648, %v724_v63  ;;  %vm729_vm11 = vcmp.eq.f32.partialorder %v724_v63, 0.0 }
 0x1ac   :  { %914 = vrsqrt.f32 %v733_v41  ;;  %vm736_vm8 = vcmp.eq.f32.partialorder %v733_v41, inf  ;;  %v739_v46 = vand.u32 2147483648, %v733_v41  ;;  %vm738_vm9 = vcmp.eq.f32.partialorder %v733_v41, 0.0 }
 0x1ad   :  { %916 = vrsqrt.f32 %v724_v63 }
 0x1ae   :  { %701 = vadd.xlane.f32.xlu1 %v700_v43 }
 0x1b6   :  { %v915_v44 = vpop.eup %914 }
 0x1b7   :  { %v735_v45 = vmul.f32 %v915_v44, %v733_v41  ;;  %v917_v1 = vpop.eup %916 }
 0x1b8   :  { %v726_v2 = vmul.f32 %v917_v1, %v724_v63 }
 0x1b9   :  { %v737_v47 = vsel %vm736_vm8, %v733_v41, %v735_v45 }
 0x1ba   :  { %v740_v48 = vsel %vm738_vm9, %v739_v46, %v737_v47  ;;  %v728_v3 = vsel %vm727_vm10, %v724_v63, %v726_v2  ;;  %v717_v47 = vrot.slane %v716_v35, 2 }
 0x1bb   :  { %v753_v49 = vsub.f32 1.0, %v740_v48  ;;  %v731_v5 = vsel %vm729_vm11, %v730_v4, %v728_v3 }
 0x1bc   :  { %v741_v12 = vsub.f32 1.0, %v731_v5  ;;  %v718_v62 = vadd.f32 %v717_v47, %v716_v35 }
 0x1bd   :  { %v754_v51 = vmax.f32 %v753_v49, 0.0 }
 0x1be   :  { %v742_v14 = vmax.f32 %v741_v12, 0.0 }
 0x1bf   :  { %v755_v52 = vsel %vm507_vm2, %v754_v51, 0.0 }
 0x1c0   :  { %756 = vadd.xlane.f32.xlu0 %v755_v52  ;;  %v743_v15 = vsel %vm507_vm2, %v742_v14, 0.0 }
 0x228   :  { %v394_v55 = vpop.xlane.xlu0 %393 }
 0x229   :  { %v395_v57 = vrot.slane %v394_v55, 4 }
 0x22b   :  { %v396_v42 = vadd.f32 %v395_v57, %v394_v55 }
 0x22c   :  { %v571_v18 = vpop.xlane.xlu0 %570 }
 0x22d   :  { %v397_v58 = vrot.slane %v396_v42, 2  ;;  %v572_v20 = vrot.slane %v571_v18, 4 }
 0x22f   :  { %v398_v59 = vadd.f32 %v397_v58, %v396_v42  ;;  %v573_v27 = vadd.f32 %v572_v20, %v571_v18 }
 0x231   :  { %v399_v60 = vrot.slane %v398_v59, 1  ;;  %v574_v36 = vrot.slane %v573_v27, 2 }
 0x233   :  { %v400_v61 = vadd.f32 %v399_v60, %v398_v59  ;;  %v575_v48 = vadd.f32 %v574_v36, %v573_v27 }
 0x235   :  { %884 = vpush %v400_v61  ;;  %v576_v61 = vrot.slane %v575_v48, 1 }
 0x237   :  { %v537_v17 = vpop.xlane.xlu1 %536 }
 0x238   :  { %v538_v19 = vrot.slane %v537_v17, 4 }
 0x23a   :  { %v539_v23 = vadd.f32 %v538_v19, %v537_v17 }
 0x23b   :  { %v702_v21 = vpop.xlane.xlu1 %701 }
 0x23c   :  { %v703_v24 = vrot.slane %v702_v21, 4  ;;  %v540_v30 = vrot.slane %v539_v23, 2 }
 0x23e   :  { %v704_v33 = vadd.f32 %v703_v24, %v702_v21  ;;  %v541_v43 = vadd.f32 %v540_v30, %v539_v23 }
 0x240   :  { %v705_v44 = vrot.slane %v704_v33, 2  ;;  %v542_v57 = vrot.slane %v541_v43, 1 }
 0x242   :  { %v706_v60 = vadd.f32 %v705_v44, %v704_v33 }
 0x24d   :  { %v757_v25 = vpop.xlane.xlu0 %756 }
 0x24e   :  { %v758_v31 = vrot.slane %v757_v25, 4 }
 0x250   :  { %v759_v39 = vadd.f32 %v758_v31, %v757_v25 }
 0x252   :  { %v760_v52 = vrot.slane %v759_v39, 2 }
 0x254   :  { %v761_v3 = vadd.f32 %v760_v52, %v759_v39 }
 0x256   :  { %v762_v14 = vrot.slane %v761_v3, 1 }
 0x266   :  { %s885_s1 = spop %884 }
 0x26b   :  { %v499_v0 = vpop.f32.mrb[4].mxu0 }
 0x26c   :  { %v506_v6 = vmul.f32 %v499_v0, %v1076_v56  ;;  %v852_v7 = vpop.f32.mrb[5].mxu0  ;;  %v665_v8 = vpop.f32.mrb[4].mxu1  ;;  %v522_v56 = vrot.slane %v521_v16, 4 }
 0x26d   :  { %v672_v9 = vmul.f32 %v665_v8, %v1069_v50  ;;  %v863_v10 = vpop.f32.mrb[5].mxu1  ;;  %v687_v50 = vrot.slane %v686_v54, 4  ;;  %v707_v8 = vrot.slane %v706_v60, 1 }
 0x26e   :  { %v508_v11 = vsel %vm507_vm2, %v506_v6, 0.0  ;;  %v523_v22 = vadd.f32 %v522_v56, %v521_v16  ;;  %v543_v6 = vadd.f32 %v542_v57, %v541_v43  ;;  %v719_v10 = vrot.slane %v718_v62, 1 }
 0x26f   :  { %509 = vadd.xlane.f32.xlu1 %v508_v11  ;;  %v673_v13 = vsel %vm507_vm2, %v672_v9, 0.0  ;;  %v688_v28 = vadd.f32 %v687_v50, %v686_v54  ;;  %v577_v9 = vadd.f32 %v576_v61, %v575_v48  ;;  %v763_v56 = vadd.f32 %v762_v14, %v761_v3 }
 0x270   :  { %v524_v29 = vrot.slane %v523_v22, 2  ;;  %v720_v17 = vadd.f32 %v719_v10, %v718_v62 }
 0x271   :  { %v689_v38 = vrot.slane %v688_v28, 2 }
 0x272   :  { %v525_v41 = vadd.f32 %v524_v29, %v523_v22 }
 0x273   :  { %674 = vadd.xlane.f32.xlu1 %v673_v13  ;;  %v690_v42 = vadd.f32 %v689_v38, %v688_v28 }
 0x274   :  { %v526_v55 = vrot.slane %v525_v41, 1 }
 0x275   :  { %v691_v0 = vrot.slane %v690_v42, 1 }
 0x276   :  { %v527_v4 = vadd.f32 %v526_v55, %v525_v41 }
 0x277   :  { %744 = vadd.xlane.f32.xlu1 %v743_v15  ;;  %v692_v13 = vadd.f32 %v691_v0, %v690_v42  ;;  %v708_v15 = vadd.f32 %v707_v8, %v706_v60 }
 0x2fc   :  { %v510_v32 = vpop.xlane.xlu1 %509 }
 0x2fd   :  { %v511_v34 = vrot.slane %v510_v32, 4 }
 0x2ff   :  { %v512_v37 = vadd.f32 %v511_v34, %v510_v32 }
 0x300   :  { %v675_v40 = vpop.xlane.xlu1 %674 }
 0x301   :  { %v513_v45 = vrot.slane %v512_v37, 2  ;;  %v676_v46 = vrot.slane %v675_v40, 4 }
 0x303   :  { %v677_v49 = vadd.f32 %v676_v46, %v675_v40  ;;  %v514_v51 = vadd.f32 %v513_v45, %v512_v37 }
 0x304   :  { %v745_v54 = vpop.xlane.xlu1 %744 }
 0x305   :  { %v678_v53 = vrot.slane %v677_v49, 2  ;;  %v746_v58 = vrot.slane %v745_v54, 4  ;;  %v515_v59 = vrot.slane %v514_v51, 1 }
 0x307   :  { %v747_v63 = vadd.f32 %v746_v58, %v745_v54  ;;  %v516_v1 = vadd.f32 %v515_v59, %v514_v51  ;;  %v679_v2 = vadd.f32 %v678_v53, %v677_v49 }
 0x309   :  { %v748_v5 = vrot.slane %v747_v63, 2  ;;  %886 = vpush %v516_v1  ;;  %v680_v7 = vrot.slane %v679_v2, 1 }
 0x30a   :  { %888 = vpush %v527_v4 }
 0x30b   :  { %v749_v11 = vadd.f32 %v748_v5, %v747_v63  ;;  %890 = vpush %v543_v6  ;;  %v681_v12 = vadd.f32 %v680_v7, %v679_v2 }
 0x30c   :  { %892 = vpush %v577_v9 }
 0x30d   :  { %894 = vpush %v681_v12  ;;  %v750_v16 = vrot.slane %v749_v11, 1 }
 0x30e   :  { %896 = vpush %v692_v13 }
 0x30f   :  { %898 = vpush %v708_v15  ;;  %v751_v18 = vadd.f32 %v750_v16, %v749_v11 }
 0x310   :  { %900 = vpush %v720_v17 }
 0x311   :  { %902 = vpush %v751_v18 }
 0x312   :  { %904 = vpush %v763_v56 }
 0x33a   :  { %s887_s6 = spop %886 }
 0x33b   :  { %s529_s7 = smul.f32 32.0, %s887_s6  ;;  %s889_s8 = spop %888 }
 0x33c   :  { %s531_s9 = smul.f32 16.0, %s889_s8  ;;  %s891_s10 = spop %890 }
 0x33d   :  { %s530_s11 = ssub.f32 %s885_s1, %s529_s7  ;;  %s893_s12 = spop %892 }
 0x33e   :  { %s532_s13 = smul.f32 %s531_s9, %s531_s9  ;;  %s895_s14 = spop %894 }
 0x33f   :  { %s694_s15 = smul.f32 32.0, %s895_s14  ;;  %s897_s16 = spop %896 }
 0x340   :  { %s533_s17 = sadd.f32 %s532_s13, %s530_s11  ;;  %s696_s18 = smul.f32 16.0, %s897_s16 }
 0x341   :  { %s695_s19 = ssub.f32 %s893_s12, %s694_s15  ;;  %s899_s20 = spop %898 }
 0x342   :  { %s697_s21 = smul.f32 %s696_s18, %s696_s18  ;;  %s901_s22 = spop %900 }
 0x343   :  { %s545_s24 = ssub.f32 %s533_s17, %s891_s10  ;;  %s903_s25 = spop %902 }
 0x344   :  { %s698_s23 = sadd.f32 %s697_s21, %s695_s19  ;;  %s722_s27 = smul.f32 0.001953125, %s901_s22 }
 0x345   :  { %s905_s28 = spop %904  ;;  %s962_s9 = scalar_lea.hbm %s1141_s2, 16 }
 0x346   :  { %s710_s26 = ssub.f32 %s698_s23, %s899_s20  ;;  %s769_s3 = smul.f32 25.0, %s722_s27 }
 0x347   :  { %s765_s30 = sadd.f32 %s905_s28, %s903_s25  ;;  %p963_p2 = scmp.ne.s32.totalorder %s1141_s2, %s962_s9 }
 0x348   :  { %s767_s29 = sadd.f32 %s710_s26, %s545_s24  ;;  %p966_p3 = scmp.lt.u32.totalorder %s962_s9, %s1141_s2 }
 0x349   :  { %s766_s4 = smul.f32 0.015625, %s765_s30 }
 0x34a   :  { %s768_s0 = smul.f32 0.00013888889, %s767_s29  ;;  %p968_p4 = pnand %p966_p3, %p963_p2 }
 0x34b   :  { %s770_s5 = smul.f32 25.0, %s766_s4 }
 0x34d   :  { %s771_s1 = sadd.f32 %s770_s5, %s769_s3 }
 0x34f   :  { %s772_s6 = sadd.f32 %s771_s1, %s768_s0 }
 0x351   :  { %774 = sst [smem:[#allocation12]] %s772_s6 }
 0x352   :  { %971 = shalt.err (!%p968_p4)
}
 0x353   :  { %s985_s14 = smov [#allocation12]  }
 0x354   :  { %782 = dma.smem_to_hbm %s985_s14, 16, %s1141_s2, [#allocation9]  }
 0x355   :  { %976 = dma.done.wait [#allocation9], 16  }
 0x356   :  { %977 = vsyncadd [#allocation9], 4294967280 }
 0x357   :  { %786 = sfence }
 0x358   :  { %787 = vsyncpa [#allocation8], 1 }
 0x359   :  { %788 = vsyncpa [#allocation11], 1 }
 0x35a   :  { %789 = vsyncpa [#allocation9], 1 }

</bundles_post_ra>
